<compile_context>
chip_gen: v5e
topology: v5e:2x2
jax: 0.10.0
libtpu: 0.0.40
codegen_flags: <defaults>
</compile_context>

<pallas_src>
import functools
import math

import jax
import jax.numpy as jnp
from jax.experimental import pallas as pl
from jax.experimental.pallas import tpu as pltpu

LANE = 128


def _round_up(x, m):
    return ((x + m - 1) // m) * m


def _vmem_budget_bytes():
    """Usable VMEM budget, generation-aware but conservative.

    v4/v5e/v6e have 128 MiB physical VMEM -> ~100 MiB usable; v7x has
    64 MiB per TensorCore -> stay below 48 MiB; unknown parts use the
    everywhere-safe 48 MiB default.
    """
    try:
        kind = jax.devices()[0].device_kind.lower()
    except Exception:
        kind = ""
    if any(t in kind for t in ("v2", "v3")):
        return 12 * 1024 * 1024
    if any(t in kind for t in ("v4", "v5", "v6")):
        return 100 * 1024 * 1024
    return 48 * 1024 * 1024


def _pick_tile_m(n_pad, per_row_bytes, fixed_bytes, budget):
    """Largest 128-multiple row tile that fits the VMEM budget, preferring an
    even tile count (balanced split across v7x's two TensorCores)."""
    cands = [t for t in (1024, 512, 256, 128) if t <= n_pad and n_pad % t == 0]
    if not cands:
        return n_pad
    fits = [t for t in cands if fixed_bytes + t * per_row_bytes <= budget] or [cands[-1]]
    even = [t for t in fits if (n_pad // t) % 2 == 0 and (n_pad // t) >= 2]
    return (even or fits)[0]


def _pick_tile_fused(n_pad):
    for t in (512, 256, 128):
        if n_pad % t == 0 and n_pad // t >= 2:
            return t
    return n_pad


# --------------------------------------------------------------------------
# Fused kernel: all three GraphConvolution layers in one pallas_call.
# grid = (layer, row_tile); adj / x / per-layer W,b resident in VMEM;
# activations ping-pong between two VMEM scratch slabs.
# --------------------------------------------------------------------------
def _fused_kernel(adj_ref, x_ref, w_ref, b_ref, out_ref, h_ref, *,
                  tile_m, n_layers):
    l = pl.program_id(0)
    i = pl.program_id(1)
    row0 = pl.multiple_of(i * tile_m, tile_m)

    # Seed the ping-pong activation buffer with x once (slot 0 is layer-0 input).
    @pl.when(jnp.logical_and(l == 0, i == 0))
    def _():
        h_ref[0, :, :] = x_ref[...].astype(h_ref.dtype)

    src = l % 2
    dst = (l + 1) % 2

    # (tile_m, n_pad) @ (n_pad, P): adj rows are sliced from the resident block.
    adj_rows = adj_ref[pl.ds(row0, tile_m), :]
    t = jnp.dot(adj_rows, h_ref[src], preferred_element_type=jnp.float32)
    # Small per-tile projection + bias (weights stay f32 for accuracy).
    t = jnp.dot(t, w_ref[0], preferred_element_type=jnp.float32) + b_ref[0]

    is_last = l == n_layers - 1
    h_val = jnp.where(is_last, t, jnp.maximum(t, 0.0))   # no relu on last layer

    # Store the next layer's input tile (not needed on the last layer).
    @pl.when(jnp.logical_not(is_last))
    def _():
        h_ref[dst, pl.ds(row0, tile_m), :] = h_val.astype(h_ref.dtype)

    # Residual + output; only the last layer's writeback survives in HBM.
    x_rows = x_ref[pl.ds(row0, tile_m), :]
    resid = jnp.where(is_last, jnp.float32(1.0), jnp.float32(0.0))
    out_ref[...] = (h_val + resid * x_rows).astype(out_ref.dtype)


def _st_fused(adj_p, x_p, w_stack, b_stack, *, tile_m, cdt, vmem_limit):
    n_pad, p_dim = x_p.shape
    n_layers = w_stack.shape[0]
    n_tiles = n_pad // tile_m

    kernel = functools.partial(_fused_kernel, tile_m=tile_m, n_layers=n_layers)

    return pl.pallas_call(
        kernel,
        out_shape=jax.ShapeDtypeStruct((n_pad, p_dim), jnp.float32),
        grid_spec=pltpu.PrefetchScalarGridSpec(
            num_scalar_prefetch=0,
            grid=(n_layers, n_tiles),
            in_specs=[
                pl.BlockSpec((n_pad, n_pad), lambda l, i: (0, 0)),   # adj: resident
                pl.BlockSpec((n_pad, p_dim), lambda l, i: (0, 0)),   # x: resident
                pl.BlockSpec((1, p_dim, p_dim), lambda l, i: (l, 0, 0)),  # W_l
                pl.BlockSpec((1, 1, p_dim), lambda l, i: (l, 0, 0)),      # b_l
            ],
            out_specs=pl.BlockSpec((tile_m, p_dim), lambda l, i: (i, 0)),
            scratch_shapes=[pltpu.VMEM((2, n_pad, p_dim), cdt)],     # h ping-pong
        ),
        compiler_params=pltpu.CompilerParams(
            # layer l+1 tile 0 needs every tile of layer l -> sequential grid
            dimension_semantics=("arbitrary", "arbitrary"),
            vmem_limit_bytes=vmem_limit,
        ),
    )(adj_p, x_p, w_stack, b_stack)


# --------------------------------------------------------------------------
# Per-layer fallback: adj streamed from HBM in row tiles (double-buffered by
# the BlockSpec pipeline); activations / weights / bias fully VMEM-resident.
# --------------------------------------------------------------------------
def _gc_layer_kernel(*refs, relu, residual, project):
    it = iter(refs)
    adj_ref = next(it)
    h_ref = next(it)
    w_ref = next(it) if project else None
    b_ref = next(it)
    x_ref = next(it) if residual else None
    out_ref = next(it)

    t = jnp.dot(adj_ref[...], h_ref[...], preferred_element_type=jnp.float32)
    if project:
        t = jnp.dot(t, w_ref[...], preferred_element_type=jnp.float32)
    t = t + b_ref[...]
    if relu:
        t = jnp.maximum(t, 0.0)
    if x_ref is not None:
        t = t + x_ref[...]
    out_ref[...] = t.astype(out_ref.dtype)


def _graph_conv(adj_p, h_p, b_p, *, w_p=None, relu, residual=None,
                tile_m, out_dtype, budget):
    n_pad = adj_p.shape[0]
    f_in = h_p.shape[1]
    f_out = w_p.shape[1] if w_p is not None else f_in
    assert n_pad % tile_m == 0 and tile_m % 8 == 0

    in_specs = [
        pl.BlockSpec((tile_m, n_pad), lambda i: (i, 0)),  # adj rows: streamed
        pl.BlockSpec((n_pad, f_in), lambda i: (0, 0)),    # activations: resident
    ]
    args = [adj_p, h_p]
    if w_p is not None:
        in_specs.append(pl.BlockSpec((f_in, f_out), lambda i: (0, 0)))
        args.append(w_p)
    in_specs.append(pl.BlockSpec((1, f_out), lambda i: (0, 0)))
    args.append(b_p)
    if residual is not None:
        in_specs.append(pl.BlockSpec((tile_m, f_out), lambda i: (i, 0)))
        args.append(residual)

    adj_b = jnp.dtype(adj_p.dtype).itemsize
    h_b = jnp.dtype(h_p.dtype).itemsize
    out_b = jnp.dtype(out_dtype).itemsize
    est = (2 * tile_m * n_pad * adj_b            # adj tile, double-buffered
           + 2 * n_pad * f_in * h_b              # resident activations
           + 2 * (f_in * f_out + f_out) * 4      # weight + bias
           + 2 * tile_m * f_out * out_b          # out tiles
           + (2 * tile_m * f_out * 4 if residual is not None else 0)
           + 2 * tile_m * max(f_in, f_out) * 4)  # intermediate headroom
    vmem_limit = int(min(max(int(1.5 * est), 32 * 1024 * 1024), budget))

    kernel = functools.partial(_gc_layer_kernel, relu=relu,
                               residual=residual is not None,
                               project=w_p is not None)

    return pl.pallas_call(
        kernel,
        out_shape=jax.ShapeDtypeStruct((n_pad, f_out), out_dtype),
        grid_spec=pltpu.PrefetchScalarGridSpec(
            num_scalar_prefetch=0,
            grid=(n_pad // tile_m,),
            in_specs=in_specs,
            out_specs=pl.BlockSpec((tile_m, f_out), lambda i: (i, 0)),
        ),
        compiler_params=pltpu.CompilerParams(
            dimension_semantics=("parallel",),   # row tiles independent
            vmem_limit_bytes=vmem_limit,
        ),
    )(*args)


# --------------------------------------------------------------------------
# Public forward
# --------------------------------------------------------------------------
def st_forward(x, adj, params, *, compute_dtype=jnp.bfloat16, fuse=None,
               tile_m=None):
    """x: (N, F_in) f32, adj: (N, N) f32, params: dict of weights/biases.

    compute_dtype: dtype of adj / streamed activations feeding the N^2 matmul
    (accumulation is always f32).  bf16 (default) is ~2x faster; f32 is the
    debug path.
    """
    n, f_in = x.shape
    hidden = params["w1"].shape[1]
    cdt = jnp.dtype(compute_dtype)

    f_pad = _round_up(f_in, LANE)
    g_pad = _round_up(hidden, LANE)
    n_pad = _round_up(n, LANE)
    p_dim = max(f_pad, g_pad)
    budget = _vmem_budget_bytes()

    # Fused feasibility: count resident blocks as double-buffered to stay
    # safe under v7x's 64 MiB ceiling even without pl.Buffered(1).
    fused_bytes = (2 * n_pad * n_pad * cdt.itemsize      # adj resident
                   + 2 * n_pad * p_dim * 4               # x resident (f32)
                   + 2 * n_pad * p_dim * cdt.itemsize    # h ping-pong scratch
                   + 4 * p_dim * p_dim * 4               # W/b blocks
                   + 4 * min(n_pad, 512) * p_dim * 4     # out tiles
                   + (2 << 20))                          # headroom
    if fuse is None:
        fuse = fused_bytes <= int(0.9 * budget)

    if fuse:
        if tile_m is None:
            tile_m = _pick_tile_fused(n_pad)
        assert n_pad % tile_m == 0 and tile_m % 8 == 0

        # Lane-dense padding; padded adj rows/columns are zero (columns MUST
        # stay zero: they mask the relu(bias) garbage in padded h rows).
        x_p = jnp.zeros((n_pad, p_dim), jnp.float32).at[:n, :f_in].set(x)
        adj_p = jnp.zeros((n_pad, n_pad), cdt).at[:n, :n].set(adj.astype(cdt))
        w_stack = jnp.zeros((3, p_dim, p_dim), jnp.float32)
        w_stack = w_stack.at[0, :f_in, :hidden].set(params["w1"])
        w_stack = w_stack.at[1, :hidden, :hidden].set(params["w2"])
        w_stack = w_stack.at[2, :hidden, :f_in].set(params["w3"])
        b_stack = jnp.zeros((3, 1, p_dim), jnp.float32)
        b_stack = b_stack.at[0, :, :hidden].set(params["b1"])
        b_stack = b_stack.at[1, :, :hidden].set(params["b2"])
        b_stack = b_stack.at[2, :, :f_in].set(params["b3"])

        vmem_limit = int(min(max(int(1.25 * fused_bytes), 32 * 1024 * 1024),
                             budget))
        out = _st_fused(adj_p, x_p, w_stack, b_stack, tile_m=tile_m, cdt=cdt,
                        vmem_limit=vmem_limit)
        return out[:n, :f_in]

    # ---------------- per-layer fallback (adj too big for VMEM) -------------
    adj_p = jnp.zeros((n_pad, n_pad), cdt).at[:n, :n].set(adj.astype(cdt))
    x_p = jnp.zeros((n_pad, f_pad), jnp.float32).at[:n, :f_in].set(x)
    w2_p = jnp.zeros((g_pad, g_pad), jnp.float32).at[:hidden, :hidden].set(params["w2"])
    w3_p = jnp.zeros((g_pad, f_pad), jnp.float32).at[:hidden, :f_in].set(params["w3"])
    b1_p = jnp.zeros((1, g_pad), jnp.float32).at[:, :hidden].set(params["b1"])
    b2_p = jnp.zeros((1, g_pad), jnp.float32).at[:, :hidden].set(params["b2"])
    b3_p = jnp.zeros((1, f_pad), jnp.float32).at[:, :f_in].set(params["b3"])

    if tile_m is None:
        per_row = 2 * n_pad * cdt.itemsize + 8 * p_dim * 4
        fixed = 2 * n_pad * g_pad * cdt.itemsize + 4 * p_dim * p_dim * 4 + (2 << 20)
        tile_m = _pick_tile_m(n_pad, per_row, fixed, budget)
    assert n_pad % tile_m == 0 and tile_m % 8 == 0

    # Layer 1: module association.  x @ W1 is a tiny matmul, done outside, so
    # the kernel streams adj against the already-projected g_pad-wide
    # activation and skips the per-tile projection matmul.
    s1_p = jnp.zeros((n_pad, g_pad), cdt).at[:n, :hidden].set(
        (x @ params["w1"]).astype(cdt))

    # h1/h2 are written by the kernels directly in the next layer's compute
    # dtype (no external cast passes, half the resident-h footprint).
    h1 = _graph_conv(adj_p, s1_p, b1_p, relu=True, tile_m=tile_m,
                     out_dtype=cdt, budget=budget)
    h2 = _graph_conv(adj_p, h1, b2_p, w_p=w2_p, relu=True, tile_m=tile_m,
                     out_dtype=cdt, budget=budget)
    out = _graph_conv(adj_p, h2, b3_p, w_p=w3_p, relu=False, residual=x_p,
                      tile_m=tile_m, out_dtype=jnp.float32, budget=budget)
    return out[:n, :f_in]


def init_params(key, input_size, hidden_size):
    """Mirrors GraphConvolution.reset_parameters: uniform(-stdv, stdv),
    stdv = 1/sqrt(out_features)."""
    def gc_init(k, fin, fout):
        stdv = 1.0 / math.sqrt(fout)
        kw, kb = jax.random.split(k)
        w = jax.random.uniform(kw, (fin, fout), jnp.float32, -stdv, stdv)
        b = jax.random.uniform(kb, (1, fout), jnp.float32, -stdv, stdv)
        return w, b

    k1, k2, k3 = jax.random.split(key, 3)
    w1, b1 = gc_init(k1, input_size, hidden_size)
    w2, b2 = gc_init(k2, hidden_size, hidden_size)
    w3, b3 = gc_init(k3, hidden_size, input_size)
    return {"w1": w1, "b1": b1, "w2": w2, "b2": b2, "w3": w3, "b3": b3}


def st_reference(x, adj, p):
    """Pure-JAX f32 reference in the PyTorch evaluation order adj @ (h @ W)."""
    def layer(h, w, b):
        return adj @ (h @ w) + b
    h = jnp.maximum(layer(x, p["w1"], p["b1"]), 0.0)
    h = jnp.maximum(layer(h, p["w2"], p["b2"]), 0.0)
    return layer(h, p["w3"], p["b3"]) + x


if __name__ == "__main__":
    N = 256           # graph nodes (padded to multiples of the row tile)
    input_size = 16   # input feature dim (zero-padded to 128 lanes)
    hidden_size = 32  # hidden feature dim (zero-padded to 128 lanes)

    key = jax.random.PRNGKey(0)
    kx, kadj, kp = jax.random.split(key, 3)

    x = jax.random.normal(kx, (N, input_size), jnp.float32)
    a = jax.random.uniform(kadj, (N, N), jnp.float32)
    adj = (a + a.T) * 0.5
    adj = adj / jnp.sum(adj, axis=-1, keepdims=True)   # row-normalized adjacency

    params = init_params(kp, input_size, hidden_size)
    ref = st_reference(x, adj, params)

    # Default path: bf16 compute, single fused kernel (adj fits VMEM easily).
    out_bf16 = jax.jit(st_forward)(x, adj, params)
    out_bf16 = jax.block_until_ready(out_bf16)
    assert out_bf16.shape == ref.shape
    # bf16 adj / activations -> loose tolerance vs the f32 (PyTorch-order) ref.
    assert jnp.allclose(out_bf16, ref, atol=2e-2, rtol=2e-2), \
        "bf16 fused path mismatch vs f32 reference"

    # Debug path: f32 compute through the per-layer streamed-adj kernels
    # (exercises the fallback used when adj does not fit in VMEM).
    out_f32 = jax.jit(functools.partial(st_forward, compute_dtype=jnp.float32,
                                        fuse=False, tile_m=128))(x, adj, params)
    out_f32 = jax.block_until_ready(out_f32)
    assert jnp.allclose(out_f32, ref, atol=1e-3, rtol=1e-3), \
        "f32 per-layer path mismatch vs f32 reference"

    print("KERNEL_OK")
</pallas_src>

<mosaic_0001>
module attributes {stable_mosaic.version = 11 : i64} {
  func.func @_fused_kernel(%arg0: i32, %arg1: i32, %arg2: memref<256x256xbf16, #tpu.memory_space<vmem>>, %arg3: memref<256x128xf32, #tpu.memory_space<vmem>>, %arg4: memref<1x128x128xf32, #tpu.memory_space<vmem>>, %arg5: memref<1x1x128xf32, #tpu.memory_space<vmem>>, %arg6: memref<128x128xf32, #tpu.memory_space<vmem>>, %arg7: memref<2x256x128xbf16, #tpu.memory_space<vmem>>) attributes {dimension_semantics = [#tpu.dimension_semantics<arbitrary>, #tpu.dimension_semantics<arbitrary>], iteration_bounds = array<i64: 3, 2>, scalar_prefetch = 0 : i64, scratch_operands = 1 : i64, tpu.core_type = #tpu.core_type<tc>, window_params = [{pipeline_mode = #tpu.pipeline_mode<synchronous>, transform_indices = @transform_0, window_bounds = array<i64: 256, 256>}, {pipeline_mode = #tpu.pipeline_mode<synchronous>, transform_indices = @transform_1, window_bounds = array<i64: 256, 128>}, {transform_indices = @transform_2, window_bounds = array<i64: 1, 128, 128>}, {transform_indices = @transform_3, window_bounds = array<i64: 1, 1, 128>}, {transform_indices = @transform_4, window_bounds = array<i64: 128, 128>}]} {
    %c128_i32 = arith.constant 128 : i32
    %0 = arith.muli %arg1, %c128_i32 : i32
    %1 = tpu.assume_multiple %0, 128 : i32
    %c0_i32 = arith.constant 0 : i32
    %2 = arith.cmpi eq, %arg0, %c0_i32 : i32
    %c0_i32_0 = arith.constant 0 : i32
    %3 = arith.cmpi eq, %arg1, %c0_i32_0 : i32
    %4 = arith.andi %2, %3 : i1
    %5 = arith.extui %4 : i1 to i32
    %c0_i32_1 = arith.constant 0 : i32
    %6 = arith.cmpi ne, %5, %c0_i32_1 : i32
    scf.if %6 {
      %c0_30 = arith.constant 0 : index
      %c0_31 = arith.constant 0 : index
      %55 = vector.load %arg3[%c0_30, %c0_31] : memref<256x128xf32, #tpu.memory_space<vmem>>, vector<256x128xf32>
      %56 = arith.truncf %55 : vector<256x128xf32> to vector<256x128xbf16>
      %c0_32 = arith.constant 0 : index
      %c0_33 = arith.constant 0 : index
      %c0_34 = arith.constant 0 : index
      %57 = vector.load %arg7[%c0_32, %c0_33, %c0_34] : memref<2x256x128xbf16, #tpu.memory_space<vmem>>, vector<1x256x128xbf16>
      %58 = vector.shape_cast %57 : vector<1x256x128xbf16> to vector<256x128xbf16>
      %59 = vector.shape_cast %56 : vector<256x128xbf16> to vector<1x256x128xbf16>
      tpu.vector_store %arg7[%c0_32, %c0_33, %c0_34], %59 {strides = array<i32>} : memref<2x256x128xbf16, #tpu.memory_space<vmem>>, vector<1x256x128xbf16>,
    } else {
    }
    %c2_i32 = arith.constant 2 : i32
    %c0_i32_2 = arith.constant 0 : i32
    %7 = arith.cmpi eq, %c2_i32, %c0_i32_2 : i32
    %c1_i32 = arith.constant 1 : i32
    %8 = arith.select %7, %c1_i32, %c2_i32 : i32
    %9 = arith.remsi %arg0, %8 : i32
    %c0_i32_3 = arith.constant 0 : i32
    %10 = arith.cmpi ne, %9, %c0_i32_3 : i32
    %c0_i32_4 = arith.constant 0 : i32
    %11 = arith.cmpi slt, %9, %c0_i32_4 : i32
    %c0_i32_5 = arith.constant 0 : i32
    %12 = arith.cmpi slt, %8, %c0_i32_5 : i32
    %13 = arith.xori %11, %12 : i1
    %14 = arith.andi %13, %10 : i1
    %15 = arith.addi %9, %8 : i32
    %16 = arith.select %14, %15, %9 : i32
    %c1_i32_6 = arith.constant 1 : i32
    %17 = arith.addi %arg0, %c1_i32_6 : i32
    %c2_i32_7 = arith.constant 2 : i32
    %c0_i32_8 = arith.constant 0 : i32
    %18 = arith.cmpi eq, %c2_i32_7, %c0_i32_8 : i32
    %c1_i32_9 = arith.constant 1 : i32
    %19 = arith.select %18, %c1_i32_9, %c2_i32_7 : i32
    %20 = arith.remsi %17, %19 : i32
    %c0_i32_10 = arith.constant 0 : i32
    %21 = arith.cmpi ne, %20, %c0_i32_10 : i32
    %c0_i32_11 = arith.constant 0 : i32
    %22 = arith.cmpi slt, %20, %c0_i32_11 : i32
    %c0_i32_12 = arith.constant 0 : i32
    %23 = arith.cmpi slt, %19, %c0_i32_12 : i32
    %24 = arith.xori %22, %23 : i1
    %25 = arith.andi %24, %21 : i1
    %26 = arith.addi %20, %19 : i32
    %27 = arith.select %25, %26, %20 : i32
    %28 = arith.index_cast %1 : i32 to index
    %c0 = arith.constant 0 : index
    %29 = vector.load %arg2[%28, %c0] : memref<256x256xbf16, #tpu.memory_space<vmem>>, vector<128x256xbf16>
    %30 = arith.index_cast %16 : i32 to index
    %c0_13 = arith.constant 0 : index
    %c0_14 = arith.constant 0 : index
    %31 = vector.load %arg7[%30, %c0_13, %c0_14] : memref<2x256x128xbf16, #tpu.memory_space<vmem>>, vector<1x256x128xbf16>
    %32 = vector.shape_cast %31 : vector<1x256x128xbf16> to vector<256x128xbf16>
    %cst = arith.constant dense<0.000000e+00> : vector<128x128xf32>
    %33 = tpu.matmul %29, %32, %cst {dimension_numbers = #tpu.dot_dimension_numbers<[1], [0], [0], [1], [0, 0, 1, 1], [], []>} : vector<128x256xbf16>, vector<256x128xbf16>, vector<128x128xf32> -> vector<128x128xf32>
    %c0_15 = arith.constant 0 : index
    %c0_16 = arith.constant 0 : index
    %c0_17 = arith.constant 0 : index
    %34 = vector.load %arg4[%c0_15, %c0_16, %c0_17] : memref<1x128x128xf32, #tpu.memory_space<vmem>>, vector<1x128x128xf32>
    %35 = vector.shape_cast %34 : vector<1x128x128xf32> to vector<128x128xf32>
    %cst_18 = arith.constant dense<0.000000e+00> : vector<128x128xf32>
    %36 = tpu.matmul %33, %35, %cst_18 {dimension_numbers = #tpu.dot_dimension_numbers<[1], [0], [0], [1], [0, 0, 1, 1], [], []>} : vector<128x128xf32>, vector<128x128xf32>, vector<128x128xf32> -> vector<128x128xf32>
    %c0_19 = arith.constant 0 : index
    %c0_20 = arith.constant 0 : index
    %c0_21 = arith.constant 0 : index
    %37 = vector.load %arg5[%c0_19, %c0_20, %c0_21] : memref<1x1x128xf32, #tpu.memory_space<vmem>>, vector<1x1x128xf32>
    %38 = vector.shape_cast %37 : vector<1x1x128xf32> to vector<1x128xf32>
    %39 = vector.broadcast %38 : vector<1x128xf32> to vector<128x128xf32>
    %40 = arith.addf %36, %39 : vector<128x128xf32>
    %c2_i32_22 = arith.constant 2 : i32
    %41 = arith.cmpi eq, %arg0, %c2_i32_22 : i32
    %cst_23 = arith.constant 0.000000e+00 : f32
    %42 = vector.broadcast %cst_23 : f32 to vector<128x128xf32>
    %43 = arith.maximumf %40, %42 : vector<128x128xf32>
    %44 = arith.select %41, %40, %43 : vector<128x128xf32>
    %true = arith.constant true
    %45 = arith.xori %41, %true : i1
    %46 = arith.extui %45 : i1 to i32
    %c0_i32_24 = arith.constant 0 : i32
    %47 = arith.cmpi ne, %46, %c0_i32_24 : i32
    scf.if %47 {
      %55 = arith.truncf %44 : vector<128x128xf32> to vector<128x128xbf16>
      %56 = arith.index_cast %27 : i32 to index
      %57 = arith.index_cast %1 : i32 to index
      %c0_30 = arith.constant 0 : index
      %58 = vector.load %arg7[%56, %57, %c0_30] : memref<2x256x128xbf16, #tpu.memory_space<vmem>>, vector<1x128x128xbf16>
      %59 = vector.shape_cast %58 : vector<1x128x128xbf16> to vector<128x128xbf16>
      %60 = vector.shape_cast %55 : vector<128x128xbf16> to vector<1x128x128xbf16>
      tpu.vector_store %arg7[%56, %57, %c0_30], %60 {strides = array<i32>} : memref<2x256x128xbf16, #tpu.memory_space<vmem>>, vector<1x128x128xbf16>,
    } else {
    }
    %48 = arith.index_cast %1 : i32 to index
    %c0_25 = arith.constant 0 : index
    %49 = vector.load %arg3[%48, %c0_25] : memref<256x128xf32, #tpu.memory_space<vmem>>, vector<128x128xf32>
    %cst_26 = arith.constant 1.000000e+00 : f32
    %cst_27 = arith.constant 0.000000e+00 : f32
    %50 = arith.select %41, %cst_26, %cst_27 : f32
    %51 = vector.broadcast %50 : f32 to vector<128x128xf32>
    %52 = arith.mulf %51, %49 : vector<128x128xf32>
    %53 = arith.addf %44, %52 : vector<128x128xf32>
    %c0_28 = arith.constant 0 : index
    %c0_29 = arith.constant 0 : index
    %54 = vector.load %arg6[%c0_28, %c0_29] : memref<128x128xf32, #tpu.memory_space<vmem>>, vector<128x128xf32>
    tpu.vector_store %arg6[%c0_28, %c0_29], %53 {strides = array<i32>} : memref<128x128xf32, #tpu.memory_space<vmem>>, vector<128x128xf32>,
    return
  }
  func.func @transform_0(%arg0: i32, %arg1: i32) -> (i32, i32) {
    %c0_i32 = arith.constant 0 : i32
    %c0_i32_0 = arith.constant 0 : i32
    %c0_i32_1 = arith.constant 0 : i32
    return %c0_i32, %c0_i32_0 : i32, i32
  }
  func.func @transform_1(%arg0: i32, %arg1: i32) -> (i32, i32) {
    %c0_i32 = arith.constant 0 : i32
    %c0_i32_0 = arith.constant 0 : i32
    %c0_i32_1 = arith.constant 0 : i32
    return %c0_i32, %c0_i32_0 : i32, i32
  }
  func.func @transform_2(%arg0: i32, %arg1: i32) -> (i32, i32, i32) {
    %c0_i32 = arith.constant 0 : i32
    %c0_i32_0 = arith.constant 0 : i32
    %c0_i32_1 = arith.constant 0 : i32
    return %arg0, %c0_i32, %c0_i32_0 : i32, i32, i32
  }
  func.func @transform_3(%arg0: i32, %arg1: i32) -> (i32, i32, i32) {
    %c0_i32 = arith.constant 0 : i32
    %c0_i32_0 = arith.constant 0 : i32
    %c0_i32_1 = arith.constant 0 : i32
    return %arg0, %c0_i32, %c0_i32_0 : i32, i32, i32
  }
  func.func @transform_4(%arg0: i32, %arg1: i32) -> (i32, i32) {
    %c0_i32 = arith.constant 0 : i32
    %c0_i32_0 = arith.constant 0 : i32
    return %arg1, %c0_i32 : i32, i32
  }
}

</mosaic_0001>

<bundles_post_ra>
// kernel: st_forward.1
= control target key start
LH: loop header
LB: loop body
LE: loop exit
PB: predicated region body
PF: predicated region fallthrough
CT: control target
= control target key end

     0   :  { %s1466_s15 = smov 0   ;;  %s1468_s16 = smov 0   ;;  %s1881_s0 = inlined_call_operand.vmem [shape: bf16[256,256], index: 0, kind: input, shape index: {}]   ;;  %s1882_s1 = inlined_call_operand.vmem [shape: f32[256,128], index: 1, kind: input, shape index: {}]   ;;  %s1883_s2 = inlined_call_operand.vmem [shape: f32[3,128,128], index: 2, kind: input, shape index: {}]   ;;  %s1884_s3 = inlined_call_operand.vmem [shape: f32[3,1,128], index: 3, kind: input, shape index: {}]   ;;  %s1885_s4 = inlined_call_operand.vmem [shape: f32[256,128], index: 4, kind: output, shape index: {}]  }
   0x1   :  { %s1470_s17 = smov 0   ;;  %s1472_s18 = smov 0  }
   0x2   :  { %s1474_s19 = smov 0  }
   0x3 LB: > { %s23_s20 = sadd.s32 1, %s1431_s17  ;;  %s26_s21 = sadd.s32 1, %s1435_s18  ;;  %s1439_s19 = sphi %s1474_s19, %s14_s19   ;;  %s1435_s18 = sphi %s1472_s18, %s1891_s18   ;;  %s1431_s17 = sphi %s1470_s17, %s1890_s17   ;;  %s1427_s16 = sphi %s1468_s16, %s1889_s16   ;;  %s1423_s15 = sphi %s1466_s15, %s1888_s15  }
   0x4   : > { %p24_p0 = scmp.ge.s32.totalorder %s23_s20, 2  ;;  %p1002_p1 = scmp.ge.s32.totalorder %s1439_s19, 1 }
   0x5   : > { %p182_p2 = scmp.lt.s32.totalorder %s1439_s19, 7 }
   0x6   : > { %s1893_s20 = smov (%p24_p0, %s23_s20), 0  ;;  %s1895_s21 = smov (!%p24_p0, %s26_s21), %s1435_s18 }
   0x7   : > { %p183_p3 = pnand %p1002_p1, %p182_p2  ;;  %p28_p4 = scmp.ge.s32.totalorder %s1895_s21, 3 }
   0x8   : > { %p211_p5 = scmp.lt.s32.totalorder (!%p183_p3), %s1427_s16, 2  ;;  %s1005_s22 = sshll.u32 (!%p183_p3), %s1423_s15, 4 }
   0x9   : > { %s1897_s21 = smov (%p28_p4, %s1895_s21), 0  ;;  %186 = sbr.rel (%p183_p3) target bundleno = 470 (0x1d6), region = 36 }
   0xa   : > { %p220_p6 = scmp.lt.s32.totalorder (!%p183_p3), %s1005_s22, 31  ;;  %s1499_s23 = sshll.u32 (!%p183_p3), %s1423_s15, 7 }
   0xb   : > { %p226_p7 = scmp.eq.s32.totalorder (!%p183_p3), %s1427_s16, 0  ;;  %p227_p8 = scmp.eq.s32.totalorder (!%p183_p3), %s1423_s15, 0 }
   0xd   : > { %p228_p9 = pnand (!%p183_p3), %p227_p8, %p226_p7 }
   0xe   : > { %s1502_s24 = scalar_select %p211_p5, %s1427_s16, 2 }
   0xf   : > { %s1899_s22 = smov (!%p220_p6, %s1005_s22), 31  ;;  %231 = sbr.rel (%p228_p9) target bundleno = 39 (0x27), region = 40 }
  0x10   : > { %s1151_s25 = sshll.u32 %s1502_s24, 7  ;;  %s218_s28 = scalar_lea.vmem %s1884_s3, %s1502_s24 }
  0x11   : > { %s1512_s5 = scalar_lea.vmem %s1883_s2, %s1151_s25  ;;  %s1006_s6 = sshll.u32 %s1899_s22, 3 }
  0x12   : > { %s1517_s9 = scalar_lea.vmem %s1885_s4, %s1006_s6 }
  0x14   : > { %v232_v0 = vld [vmem:[%s1882_s1] sm:$0xff]  ;;  %v233_v1 = vld [vmem:[%s1882_s1 + $0x8] sm:$0xff]  ;;  %v234_v2 = vld [vmem:[%s1882_s1 + $0x10] sm:$0xff] }
  0x15   : > { %v1189_v3 = vpack.c.bf16 %v233_v1, %v232_v0  ;;  %v235_v4 = vld [vmem:[%s1882_s1 + $0x18] sm:$0xff]  ;;  %v236_v5 = vld [vmem:[%s1882_s1 + $0x20] sm:$0xff]  ;;  %v237_v6 = vld [vmem:[%s1882_s1 + $0x28] sm:$0xff] }
  0x16   : > { %v1194_v7 = vpack.c.bf16 %v235_v4, %v234_v2  ;;  %v1199_v8 = vpack.c.bf16 %v237_v6, %v236_v5  ;;  %v238_v9 = vld [vmem:[%s1882_s1 + $0x30] sm:$0xff]  ;;  %v239_v10 = vld [vmem:[%s1882_s1 + $0x38] sm:$0xff]  ;;  %v240_v11 = vld [vmem:[%s1882_s1 + $0x40] sm:$0xff] }
  0x17   : > { %1190 = vst [vmem:[#allocation2] sm:$0xff] %v1189_v3   ;;  %v1204_v12 = vpack.c.bf16 %v239_v10, %v238_v9  ;;  %v241_v13 = vld [vmem:[%s1882_s1 + $0x48] sm:$0xff]  ;;  %v242_v14 = vld [vmem:[%s1882_s1 + $0x50] sm:$0xff]  ;;  %v243_v15 = vld [vmem:[%s1882_s1 + $0x58] sm:$0xff] }
  0x18   : > { %1306 = vst [vmem:[#allocation2 + $0x8] sm:$0xff] %v1194_v7   ;;  %v1209_v16 = vpack.c.bf16 %v241_v13, %v240_v11  ;;  %v1214_v17 = vpack.c.bf16 %v243_v15, %v242_v14  ;;  %v244_v18 = vld [vmem:[%s1882_s1 + $0x60] sm:$0xff]  ;;  %v245_v19 = vld [vmem:[%s1882_s1 + $0x68] sm:$0xff]  ;;  %v246_v20 = vld [vmem:[%s1882_s1 + $0x70] sm:$0xff] }
  0x19   : > { %1307 = vst [vmem:[#allocation2 + $0x10] sm:$0xff] %v1199_v8   ;;  %v1219_v21 = vpack.c.bf16 %v245_v19, %v244_v18  ;;  %v247_v22 = vld [vmem:[%s1882_s1 + $0x78] sm:$0xff]  ;;  %v248_v23 = vld [vmem:[%s1882_s1 + $0x80] sm:$0xff]  ;;  %v249_v24 = vld [vmem:[%s1882_s1 + $0x88] sm:$0xff] }
  0x1a   : > { %1308 = vst [vmem:[#allocation2 + $0x18] sm:$0xff] %v1204_v12   ;;  %v1224_v25 = vpack.c.bf16 %v247_v22, %v246_v20  ;;  %v250_v26 = vld [vmem:[%s1882_s1 + $0x90] sm:$0xff]  ;;  %v251_v27 = vld [vmem:[%s1882_s1 + $0x98] sm:$0xff]  ;;  %v252_v28 = vld [vmem:[%s1882_s1 + $0xa0] sm:$0xff]  ;;  %v1229_v29 = vpack.c.bf16 %v249_v24, %v248_v23 }
  0x1b   : > { %1309 = vst [vmem:[#allocation2 + $0x20] sm:$0xff] %v1209_v16   ;;  %v253_v30 = vld [vmem:[%s1882_s1 + $0xa8] sm:$0xff]  ;;  %v254_v31 = vld [vmem:[%s1882_s1 + $0xb0] sm:$0xff]  ;;  %v255_v32 = vld [vmem:[%s1882_s1 + $0xb8] sm:$0xff]  ;;  %v1234_v33 = vpack.c.bf16 %v251_v27, %v250_v26 }
  0x1c   : > { %1310 = vst [vmem:[#allocation2 + $0x28] sm:$0xff] %v1214_v17   ;;  %v256_v34 = vld [vmem:[%s1882_s1 + $0xc0] sm:$0xff]  ;;  %v257_v35 = vld [vmem:[%s1882_s1 + $0xc8] sm:$0xff]  ;;  %v1239_v36 = vpack.c.bf16 %v253_v30, %v252_v28  ;;  %v258_v37 = vld [vmem:[%s1882_s1 + $0xd0] sm:$0xff]  ;;  %v1244_v39 = vpack.c.bf16 %v255_v32, %v254_v31 }
  0x1d   : > { %1311 = vst [vmem:[#allocation2 + $0x30] sm:$0xff] %v1219_v21   ;;  %v259_v38 = vld [vmem:[%s1882_s1 + $0xd8] sm:$0xff]  ;;  %v260_v40 = vld [vmem:[%s1882_s1 + $0xe0] sm:$0xff]  ;;  %v261_v41 = vld [vmem:[%s1882_s1 + $0xe8] sm:$0xff]  ;;  %v1249_v42 = vpack.c.bf16 %v257_v35, %v256_v34 }
  0x1e   : > { %1312 = vst [vmem:[#allocation2 + $0x38] sm:$0xff] %v1224_v25   ;;  %v262_v43 = vld [vmem:[%s1882_s1 + $0xf0] sm:$0xff]  ;;  %v263_v44 = vld [vmem:[%s1882_s1 + $0xf8] sm:$0xff]  ;;  %v1254_v45 = vpack.c.bf16 %v259_v38, %v258_v37  ;;  %v1259_v46 = vpack.c.bf16 %v261_v41, %v260_v40 }
  0x1f   : > { %1313 = vst [vmem:[#allocation2 + $0x40] sm:$0xff] %v1229_v29   ;;  %v1264_v47 = vpack.c.bf16 %v263_v44, %v262_v43 }
  0x20   : > { %1314 = vst [vmem:[#allocation2 + $0x48] sm:$0xff] %v1234_v33  }
  0x21   : > { %1315 = vst [vmem:[#allocation2 + $0x50] sm:$0xff] %v1239_v36  }
  0x22   : > { %1316 = vst [vmem:[#allocation2 + $0x58] sm:$0xff] %v1244_v39  }
  0x23   : > { %1317 = vst [vmem:[#allocation2 + $0x60] sm:$0xff] %v1249_v42  }
  0x24   : > { %1318 = vst [vmem:[#allocation2 + $0x68] sm:$0xff] %v1254_v45  }
  0x25   : > { %1319 = vst [vmem:[#allocation2 + $0x70] sm:$0xff] %v1259_v46  }
  0x26   : > { %1320 = vst [vmem:[#allocation2 + $0x78] sm:$0xff] %v1264_v47  }
  0x27 PF: > { %p328_p10 = scmp.lt.s32.totalorder %s1427_s16, 0  ;;  %s329_s14 = ssub.s32 0, %s1427_s16  ;;  %v698_v36 = vld [vmem:[%s1512_s5 + $0x78] sm:$0xff]  ;;  %v697_v37 = vld [vmem:[%s1512_s5 + $0x70] sm:$0xff]  ;;  %v696_v38 = vld [vmem:[%s1512_s5 + $0x68] sm:$0xff] }
  0x28   : > { %s1008_s25 = smin.u32 %s1427_s16, %s329_s14  ;;  %s340_s22 = sadd.s32 1, %s1427_s16  ;;  %703 = vmatpush.msra.mxu2 %v698_v36  ;;  %v695_v39 = vld [vmem:[%s1512_s5 + $0x60] sm:$0xff]  ;;  %v694_v40 = vld [vmem:[%s1512_s5 + $0x58] sm:$0xff]  ;;  %v693_v43 = vld [vmem:[%s1512_s5 + $0x50] sm:$0xff] }
  0x29   : > { %s331_s26 = sand.u32 1, %s1008_s25   ;;  %p341_p11 = scmp.lt.s32.totalorder %s340_s22, 0  ;;  %v692_v46 = vld [vmem:[%s1512_s5 + $0x48] sm:$0xff] }
  0x2a   : > { %s332_s15 = ssub.s32 0, %s331_s26  ;;  %s342_s27 = ssub.s32 0, %s340_s22  ;;  %704 = vmatpush.msra.mxu2 %v697_v37 }
  0x2b   : > { %s1901_s15 = smov (!%p328_p10, %s332_s15), %s331_s26  ;;  %s1011_s29 = smin.u32 %s342_s27, %s340_s22 }
  0x2c   : > { %s353_s30 = sshra.s32 %s1499_s23, 3  ;;  %p1010_p12 = scmp.lt.s32.totalorder %s1901_s15, 0  ;;  %705 = vmatpush.msra.mxu2 %v696_v38 }
  0x2d   : > { %s338_s6 = sadd.s32 2, %s1901_s15  ;;  %s344_s7 = sand.u32 1, %s1011_s29  }
  0x2e   : > { %s1903_s6 = smov (!%p1010_p12, %s338_s6), %s1901_s15  ;;  %s345_s8 = ssub.s32 0, %s344_s7  ;;  %706 = vmatpush.msra.mxu2 %v695_v39 }
  0x2f   : > { %s1905_s8 = smov (!%p341_p11, %s345_s8), %s344_s7  ;;  %s1169_s10 = sshll.u32 %s1903_s6, 7 }
  0x30   : > { %p1013_p13 = scmp.lt.s32.totalorder %s1905_s8, 0  ;;  %s351_s11 = sadd.s32 2, %s1905_s8  ;;  %707 = vmatpush.msra.mxu2 %v694_v40 }
  0x31   : > { %s1623_s12 = scalar_lea.vmem [#allocation2], %s1169_s10  ;;  %s1642_s25 = scalar_lea.vmem %s1881_s0, %s1499_s23 }
  0x32   : > { %s1907_s11 = smov (!%p1013_p13, %s351_s11), %s1905_s8  ;;  %v1177_v48 = vld [vmem:[%s1623_s12 + $0x38] sm:$0xff]  ;;  %v1176_v50 = vld [vmem:[%s1623_s12 + $0x30] sm:$0xff]  ;;  %v1175_v52 = vld [vmem:[%s1623_s12 + $0x28] sm:$0xff]  ;;  %708 = vmatpush.msra.mxu2 %v693_v43  ;;  %p768_p0 = scmp.eq.s32.totalorder %s1427_s16, 2 }
  0x33   : > { %v1185_v49 = vld [vmem:[%s1623_s12 + $0x78] sm:$0xff]  ;;  %585 = vmatpush.bf16.msra.mxu0 %v1177_v48  ;;  %1328 = vmatpush.bf16.msra.mxu3 %v1177_v48  ;;  %v1184_v51 = vld [vmem:[%s1623_s12 + $0x70] sm:$0xff]  ;;  %v1183_v53 = vld [vmem:[%s1623_s12 + $0x68] sm:$0xff]  ;;  %s1147_s24 = sshll.u32 (!%p768_p0), %s1907_s11, 5 }
  0x34   : > { %634 = vmatpush.bf16.msra.mxu1 %v1185_v49  ;;  %v1174_v54 = vld [vmem:[%s1623_s12 + $0x20] sm:$0xff]  ;;  %v1173_v56 = vld [vmem:[%s1623_s12 + $0x18] sm:$0xff]  ;;  %v1172_v58 = vld [vmem:[%s1623_s12 + $0x10] sm:$0xff]  ;;  %709 = vmatpush.msra.mxu2 %v692_v46 }
  0x35   : > { %v1182_v55 = vld [vmem:[%s1623_s12 + $0x60] sm:$0xff]  ;;  %v1181_v57 = vld [vmem:[%s1623_s12 + $0x58] sm:$0xff]  ;;  %v1180_v59 = vld [vmem:[%s1623_s12 + $0x50] sm:$0xff] }
  0x36   : > { %v1171_v60 = vld [vmem:[%s1623_s12 + $0x8] sm:$0xff]  ;;  %v1020_v62 = vld [vmem:[%s1642_s25] sm:$0xf]  ;;  %v1153_v4 = vld [vmem:[%s1642_s25 + $0x4] sm:$0xf] }
  0x37   : > { %586 = vmatpush.bf16.msra.mxu0 %v1176_v50  ;;  %1329 = vmatpush.bf16.msra.mxu3 %v1176_v50  ;;  %v1179_v61 = vld [vmem:[%s1623_s12 + $0x48] sm:$0xff]  ;;  %v1170_v0 = vld [vmem:[%s1623_s12] sm:$0xff]  ;;  %v1028_v9 = vld [vmem:[%s1642_s25 + $0x10] sm:$0xf] }
  0x38   : > { %635 = vmatpush.bf16.msra.mxu1 %v1184_v51  ;;  %v1154_v63 = vld [vmem:[%s1642_s25 + $0x4] sm:$0xf0]  ;;  %v1068_v1 = vld [vmem:[%s1642_s25 + $0x60] sm:$0xf]  ;;  %v1022_v5 = vld [vmem:[%s1642_s25 + $0x8] sm:$0xf0] }
  0x39   : > { %v1166_v2 = vld [vmem:[%s1642_s25 + $0x64] sm:$0xf0]  ;;  %v1178_v3 = vld [vmem:[%s1623_s12 + $0x40] sm:$0xff]  ;;  %v1021_v6 = vor.u32 %v1154_v63, %v1020_v62  ;;  %v1025_v8 = vor.u32 %v1153_v4, %v1022_v5  ;;  %v1156_v10 = vld [vmem:[%s1642_s25 + $0x14] sm:$0xf0] }
  0x3a   : > { %v1069_v7 = vor.u32 %v1166_v2, %v1068_v1  ;;  %v1076_v11 = vld [vmem:[%s1642_s25 + $0x70] sm:$0xf]  ;;  %v1168_v12 = vld [vmem:[%s1642_s25 + $0x74] sm:$0xf0]  ;;  %v1155_v13 = vld [vmem:[%s1642_s25 + $0x14] sm:$0xf]  ;;  %v1029_v15 = vor.u32 %v1156_v10, %v1028_v9 }
  0x3b   : > { %587 = vmatpush.bf16.msra.mxu0 %v1175_v52  ;;  %1330 = vmatpush.bf16.msra.mxu3 %v1175_v52  ;;  %v1030_v14 = vld [vmem:[%s1642_s25 + $0x18] sm:$0xf0]  ;;  %v1077_v16 = vor.u32 %v1168_v12, %v1076_v11  ;;  %v1036_v18 = vld [vmem:[%s1642_s25 + $0x20] sm:$0xf]  ;;  %v1158_v19 = vld [vmem:[%s1642_s25 + $0x24] sm:$0xf0] }
  0x3c   : > { %636 = vmatpush.bf16.msra.mxu1 %v1183_v53  ;;  %v1033_v17 = vor.u32 %v1155_v13, %v1030_v14  ;;  %v1165_v20 = vld [vmem:[%s1642_s25 + $0x64] sm:$0xf]  ;;  %v1070_v21 = vld [vmem:[%s1642_s25 + $0x68] sm:$0xf0]  ;;  %v1037_v24 = vor.u32 %v1158_v19, %v1036_v18  ;;  %v1044_v27 = vld [vmem:[%s1642_s25 + $0x30] sm:$0xf] }
  0x3d   : > { %v1157_v22 = vld [vmem:[%s1642_s25 + $0x24] sm:$0xf]  ;;  %v1038_v23 = vld [vmem:[%s1642_s25 + $0x28] sm:$0xf0]  ;;  %v1073_v25 = vor.u32 %v1165_v20, %v1070_v21  ;;  %v1160_v28 = vld [vmem:[%s1642_s25 + $0x34] sm:$0xf0] }
  0x3e   : > { %v1041_v26 = vor.u32 %v1157_v22, %v1038_v23  ;;  %v1167_v29 = vld [vmem:[%s1642_s25 + $0x74] sm:$0xf]  ;;  %v1078_v30 = vld [vmem:[%s1642_s25 + $0x78] sm:$0xf0]  ;;  %v1045_v33 = vor.u32 %v1160_v28, %v1044_v27  ;;  %v1052_v41 = vld [vmem:[%s1642_s25 + $0x40] sm:$0xf] }
  0x3f   : > { %588 = vmatpush.bf16.msra.mxu0 %v1174_v54  ;;  %1331 = vmatpush.bf16.msra.mxu3 %v1174_v54  ;;  %v1159_v31 = vld [vmem:[%s1642_s25 + $0x34] sm:$0xf]  ;;  %v1046_v32 = vld [vmem:[%s1642_s25 + $0x38] sm:$0xf0]  ;;  %v1081_v34 = vor.u32 %v1167_v29, %v1078_v30  ;;  %v1162_v42 = vld [vmem:[%s1642_s25 + $0x44] sm:$0xf0] }
  0x40   : > { %637 = vmatpush.bf16.msra.mxu1 %v1182_v55  ;;  %v1049_v35 = vor.u32 %v1159_v31, %v1046_v32  ;;  %v1161_v44 = vld [vmem:[%s1642_s25 + $0x44] sm:$0xf]  ;;  %v1054_v45 = vld [vmem:[%s1642_s25 + $0x48] sm:$0xf0]  ;;  %v1053_v47 = vor.u32 %v1162_v42, %v1052_v41  ;;  %v690_v50 = vld [vmem:[%s1512_s5 + $0x38] sm:$0xff] }
  0x41   : > { %v1057_v48 = vor.u32 %v1161_v44, %v1054_v45  ;;  %v688_v52 = vld [vmem:[%s1512_s5 + $0x28] sm:$0xff]  ;;  %v686_v54 = vld [vmem:[%s1512_s5 + $0x18] sm:$0xff]  ;;  %v683_v63 = vld [vmem:[%s1512_s5] sm:$0xff] }
  0x42   : > { %v684_v62 = vld [vmem:[%s1512_s5 + $0x8] sm:$0xff] }
  0x43   : > { %589 = vmatpush.bf16.msra.mxu0 %v1173_v56  ;;  %1332 = vmatpush.bf16.msra.mxu3 %v1173_v56  ;;  %v1164_v56 = vld [vmem:[%s1642_s25 + $0x54] sm:$0xf0] }
  0x44   : > { %638 = vmatpush.bf16.msra.mxu1 %v1181_v57 }
  0x47   : > { %590 = vmatpush.bf16.msra.mxu0 %v1172_v58  ;;  %1333 = vmatpush.bf16.msra.mxu3 %v1172_v58  ;;  %v1163_v58 = vld [vmem:[%s1642_s25 + $0x54] sm:$0xf] }
  0x48   : > { %639 = vmatpush.bf16.msra.mxu1 %v1180_v59 }
  0x4b   : > { %591 = vmatpush.bf16.msra.mxu0 %v1171_v60  ;;  %1334 = vmatpush.bf16.msra.mxu3 %v1171_v60 }
  0x4c   : > { %640 = vmatpush.bf16.msra.mxu1 %v1179_v61 }
  0x4f   : > { %592 = vmatpush.bf16.msra.mxu0 %v1170_v0  ;;  %1335 = vmatpush.bf16.msra.mxu3 %v1170_v0 }
  0x50   : > { %641 = vmatpush.bf16.msra.mxu1 %v1178_v3 }
  0x52   : > { %593 = vmatmul.bf16.vlgmr.msra.gmra.mxu0 %v1021_v6  ;;  %623 = vmatmul.bf16.vlgmr.msra.gmra.mxu3 %v1069_v7 }
  0x53   : > { %1336 = vmatpush.bf16.msrb.mxu3 %v1185_v49  ;;  %642 = vmatmul.bf16.vlgmr.msra.gmra.mxu1 %v1025_v8  ;;  %v691_v49 = vld [vmem:[%s1512_s5 + $0x40] sm:$0xff] }
  0x54   : > { %710 = vmatpush.msra.mxu2 %v691_v49 }
  0x56   : > { %711 = vmatpush.msra.mxu2 %v690_v50 }
  0x57   : > { %1337 = vmatpush.bf16.msrb.mxu3 %v1184_v51  ;;  %v689_v51 = vld [vmem:[%s1512_s5 + $0x30] sm:$0xff] }
  0x58   : > { %712 = vmatpush.msra.mxu2 %v689_v51 }
  0x5a   : > { %713 = vmatpush.msra.mxu2 %v688_v52 }
  0x5b   : > { %1338 = vmatpush.bf16.msrb.mxu3 %v1183_v53  ;;  %v687_v53 = vld [vmem:[%s1512_s5 + $0x20] sm:$0xff] }
  0x5c   : > { %714 = vmatpush.msra.mxu2 %v687_v53 }
  0x5e   : > { %715 = vmatpush.msra.mxu2 %v686_v54 }
  0x5f   : > { %1339 = vmatpush.bf16.msrb.mxu3 %v1182_v55  ;;  %v1060_v55 = vld [vmem:[%s1642_s25 + $0x50] sm:$0xf] }
  0x60   : > { %v1061_v60 = vor.u32 %v1164_v56, %v1060_v55 }
  0x62   : > { %598 = vmatmul.bf16.gmra.mxu0 %v1029_v15  ;;  %628 = vmatmul.bf16.gmra.mxu3 %v1077_v16 }
  0x63   : > { %1340 = vmatpush.bf16.msrb.mxu3 %v1181_v57  ;;  %647 = vmatmul.bf16.gmra.mxu1 %v1033_v17  ;;  %v685_v57 = vld [vmem:[%s1512_s5 + $0x10] sm:$0xff]  ;;  %s785_s5 = scalar_select %p768_p0, 1, 0 }
  0x64   : > { %716 = vmatpush.msra.mxu2 %v685_v57 }
  0x66   : > { %717 = vmatpush.msra.mxu2 %v684_v62 }
  0x67   : > { %1341 = vmatpush.bf16.msrb.mxu3 %v1180_v59  ;;  %v1062_v59 = vld [vmem:[%s1642_s25 + $0x58] sm:$0xf0] }
  0x68   : > { %718 = vmatpush.msra.mxu2 %v683_v63 }
  0x6b   : > { %1342 = vmatpush.bf16.msrb.mxu3 %v1179_v61  ;;  %v1065_v61 = vor.u32 %v1163_v58, %v1062_v59 }
  0x6f   : > { %1343 = vmatpush.bf16.msrb.mxu3 %v1178_v3 }
  0x72   : > { %603 = vmatmul.bf16.gmra.mxu0 %v1037_v24  ;;  %672 = vmatmul.bf16.vlgmr.msrb.gmra.mxu3 %v1073_v25 }
  0x73   : > { %652 = vmatmul.bf16.gmra.mxu1 %v1041_v26  ;;  %1344 = vmatpush.msra.mxu3 %v698_v36 }
  0x75   : > { %1345 = vmatpush.msra.mxu3 %v697_v37 }
  0x77   : > { %1346 = vmatpush.msra.mxu3 %v696_v38 }
  0x79   : > { %1347 = vmatpush.msra.mxu3 %v695_v39 }
  0x7b   : > { %1348 = vmatpush.msra.mxu3 %v694_v40 }
  0x7d   : > { %1349 = vmatpush.msra.mxu3 %v693_v43 }
  0x7f   : > { %1350 = vmatpush.msra.mxu3 %v692_v46 }
  0x81   : > { %1351 = vmatpush.msra.mxu3 %v691_v49  ;;  %v786_v49 = vstv %s785_s5 }
  0x82   : > { %608 = vmatmul.bf16.gmra.mxu0 %v1045_v33  ;;  %677 = vmatmul.bf16.gmra.mxu3 %v1081_v34  ;;  %vm1706_vm0 = vcmp.eq.s32.totalorder %v786_v49, 1 }
  0x83   : > { %657 = vmatmul.bf16.gmra.mxu1 %v1049_v35  ;;  %1352 = vmatpush.msra.mxu3 %v690_v50 }
  0x85   : > { %1353 = vmatpush.msra.mxu3 %v689_v51 }
  0x87   : > { %1354 = vmatpush.msra.mxu3 %v688_v52 }
  0x89   : > { %1355 = vmatpush.msra.mxu3 %v687_v53 }
  0x8b   : > { %1356 = vmatpush.msra.mxu3 %v686_v54 }
  0x8d   : > { %1357 = vmatpush.msra.mxu3 %v685_v57 }
  0x8f   : > { %1358 = vmatpush.msra.mxu3 %v684_v62 }
  0x91   : > { %1359 = vmatpush.msra.mxu3 %v683_v63 }
  0x92   : > { %613 = vmatmul.bf16.gmra.mxu0 %v1053_v47 }
  0x93   : > { %662 = vmatmul.bf16.gmra.mxu1 %v1057_v48  ;;  %v1703_v48 = vld [vmem:[%s218_s28] ss:$0 sm:$0xff]  ;;  %s825_s28 = sadd.s32 (!%p768_p0), %s1147_s24, %s353_s30 }
  0x94   : > { %s1148_s15 = sshll.u32 (!%p768_p0), %s825_s28, 2 }
  0x95   : > { %s827_s27 = scalar_lea.vmem (!%p768_p0), [#allocation2], %s1148_s15 }
  0xa2   : > { %618 = vmatmul.bf16.gmra.mxu0 %v1061_v60 }
  0xa3   : > { %667 = vmatmul.bf16.gmra.mxu1 %v1065_v61 }
  0xcf   : > { %v594_v0 = vpop.f32.mrf.mxu0 }
  0xd0   : > { %v643_v1 = vpop.f32.mrf.mxu1 }
  0xd1   : > { %v644_v2 = vadd.f32 %v643_v1, %v594_v0 }
  0xd3   : > { %719 = vmatmul.f32.vlgmr.msra.gmra.mxu2 %v644_v2 }
  0xd5   : > { %v624_v3 = vpop.f32.mrf.mxu3 }
  0xd7   : > { %v596_v4 = vpop.f32.mrf.mxu0 }
  0xd8   : > { %v645_v5 = vpop.f32.mrf.mxu1 }
  0xd9   : > { %v646_v6 = vadd.f32 %v645_v5, %v596_v4 }
  0xdb   : > { %722 = vmatmul.f32.gmra.mxu2 %v646_v6 }
  0xdd   : > { %v626_v7 = vpop.f32.mrf.mxu3 }
  0xdf   : > { %v599_v8 = vpop.f32.mrf.mxu0 }
  0xe0   : > { %v648_v9 = vpop.f32.mrf.mxu1 }
  0xe1   : > { %v649_v10 = vadd.f32 %v648_v9, %v599_v8 }
  0xe3   : > { %725 = vmatmul.f32.gmra.mxu2 %v649_v10 }
  0xe5   : > { %v629_v11 = vpop.f32.mrf.mxu3 }
  0xe7   : > { %v601_v12 = vpop.f32.mrf.mxu0 }
  0xe8   : > { %v650_v13 = vpop.f32.mrf.mxu1 }
  0xe9   : > { %v651_v14 = vadd.f32 %v650_v13, %v601_v12 }
  0xeb   : > { %728 = vmatmul.f32.gmra.mxu2 %v651_v14 }
  0xed   : > { %v631_v15 = vpop.f32.mrf.mxu3 }
  0xef   : > { %v604_v16 = vpop.f32.mrf.mxu0 }
  0xf0   : > { %v653_v17 = vpop.f32.mrf.mxu1 }
  0xf1   : > { %v654_v18 = vadd.f32 %v653_v17, %v604_v16 }
  0xf3   : > { %731 = vmatmul.f32.gmra.mxu2 %v654_v18 }
  0xf5   : > { %v673_v19 = vpop.f32.mrf.mxu3 }
  0xf6   : > { %v674_v20 = vadd.f32 %v673_v19, %v624_v3 }
  0xf7   : > { %v606_v21 = vpop.f32.mrf.mxu0 }
  0xf8   : > { %v655_v22 = vpop.f32.mrf.mxu1  ;;  %755 = vmatmul.f32.vlgmr.msra.gmra.mxu3 %v674_v20 }
  0xf9   : > { %v656_v23 = vadd.f32 %v655_v22, %v606_v21 }
  0xfb   : > { %734 = vmatmul.f32.gmra.mxu2 %v656_v23 }
  0xfd   : > { %v675_v24 = vpop.f32.mrf.mxu3 }
  0xfe   : > { %v676_v25 = vadd.f32 %v675_v24, %v626_v7 }
  0xff   : > { %v609_v26 = vpop.f32.mrf.mxu0 }
 0x100   : > { %v658_v27 = vpop.f32.mrf.mxu1  ;;  %758 = vmatmul.f32.gmra.mxu3 %v676_v25 }
 0x101   : > { %v659_v28 = vadd.f32 %v658_v27, %v609_v26 }
 0x103   : > { %737 = vmatmul.f32.gmra.mxu2 %v659_v28 }
 0x105   : > { %v678_v29 = vpop.f32.mrf.mxu3 }
 0x106   : > { %v679_v30 = vadd.f32 %v678_v29, %v629_v11 }
 0x107   : > { %v611_v31 = vpop.f32.mrf.mxu0 }
 0x108   : > { %v660_v32 = vpop.f32.mrf.mxu1  ;;  %761 = vmatmul.f32.gmra.mxu3 %v679_v30 }
 0x109   : > { %v661_v33 = vadd.f32 %v660_v32, %v611_v31 }
 0x10b   : > { %740 = vmatmul.f32.gmra.mxu2 %v661_v33 }
 0x10d   : > { %v680_v34 = vpop.f32.mrf.mxu3 }
 0x10e   : > { %v681_v35 = vadd.f32 %v680_v34, %v631_v15 }
 0x10f   : > { %v614_v36 = vpop.f32.mrf.mxu0 }
 0x110   : > { %v663_v37 = vpop.f32.mrf.mxu1  ;;  %764 = vmatmul.f32.gmra.mxu3 %v681_v35 }
 0x111   : > { %v664_v38 = vadd.f32 %v663_v37, %v614_v36 }
 0x113   : > { %743 = vmatmul.f32.gmra.mxu2 %v664_v38 }
 0x117   : > { %v616_v39 = vpop.f32.mrf.mxu0 }
 0x118   : > { %v665_v40 = vpop.f32.mrf.mxu1 }
 0x119   : > { %v666_v41 = vadd.f32 %v665_v40, %v616_v39 }
 0x11b   : > { %746 = vmatmul.f32.gmra.mxu2 %v666_v41 }
 0x11f   : > { %v619_v42 = vpop.f32.mrf.mxu0 }
 0x120   : > { %v668_v43 = vpop.f32.mrf.mxu1 }
 0x121   : > { %v669_v44 = vadd.f32 %v668_v43, %v619_v42 }
 0x123   : > { %749 = vmatmul.f32.gmra.mxu2 %v669_v44 }
 0x127   : > { %v621_v45 = vpop.f32.mrf.mxu0 }
 0x128   : > { %v670_v46 = vpop.f32.mrf.mxu1 }
 0x129   : > { %v671_v47 = vadd.f32 %v670_v46, %v621_v45 }
 0x12b   : > { %752 = vmatmul.f32.gmra.mxu2 %v671_v47 }
 0x156   : > { %v720_v50 = vpop.f32.mrf.mxu2 }
 0x157   : > { %v721_v51 = vadd.f32 %v1703_v48, %v720_v50 }
 0x159   : > { %v769_v53 = vmax.f32 %v721_v51, 0.0 }
 0x15b   : > { %v1712_v54 = vsel %vm1706_vm0, %v721_v51, %v769_v53 }
 0x15e   : > { %v723_v55 = vpop.f32.mrf.mxu2 }
 0x15f   : > { %v724_v56 = vadd.f32 %v1703_v48, %v723_v55 }
 0x161   : > { %v770_v57 = vmax.f32 %v724_v56, 0.0 }
 0x163   : > { %v1717_v58 = vsel %vm1706_vm0, %v724_v56, %v770_v57 }
 0x166   : > { %v726_v59 = vpop.f32.mrf.mxu2 }
 0x167   : > { %v727_v60 = vadd.f32 %v1703_v48, %v726_v59 }
 0x169   : > { %v771_v61 = vmax.f32 %v727_v60, 0.0 }
 0x16b   : > { %v1722_v62 = vsel %vm1706_vm0, %v727_v60, %v771_v61 }
 0x16e   : > { %v729_v63 = vpop.f32.mrf.mxu2 }
 0x16f   : > { %v730_v0 = vadd.f32 %v1703_v48, %v729_v63 }
 0x171   : > { %v772_v1 = vmax.f32 %v730_v0, 0.0 }
 0x173   : > { %v1727_v2 = vsel %vm1706_vm0, %v730_v0, %v772_v1 }
 0x176   : > { %v732_v3 = vpop.f32.mrf.mxu2 }
 0x177   : > { %v733_v4 = vadd.f32 %v1703_v48, %v732_v3 }
 0x179   : > { %v773_v5 = vmax.f32 %v733_v4, 0.0 }
 0x17b   : > { %v1732_v6 = vsel %vm1706_vm0, %v733_v4, %v773_v5  ;;  %v756_v7 = vpop.f32.mrf.mxu3 }
 0x17c   : > { %v757_v8 = vadd.f32 %v1703_v48, %v756_v7 }
 0x17e   : > { %v781_v9 = vmax.f32 %v757_v8, 0.0  ;;  %v735_v10 = vpop.f32.mrf.mxu2 }
 0x17f   : > { %v736_v11 = vadd.f32 %v1703_v48, %v735_v10 }
 0x180   : > { %v1738_v12 = vsel %vm1706_vm0, %v757_v8, %v781_v9 }
 0x181   : > { %v774_v13 = vmax.f32 %v736_v11, 0.0 }
 0x183   : > { %v1742_v14 = vsel %vm1706_vm0, %v736_v11, %v774_v13  ;;  %v759_v15 = vpop.f32.mrf.mxu3 }
 0x184   : > { %v760_v16 = vadd.f32 %v1703_v48, %v759_v15 }
 0x186   : > { %v782_v17 = vmax.f32 %v760_v16, 0.0  ;;  %v738_v18 = vpop.f32.mrf.mxu2 }
 0x187   : > { %v739_v19 = vadd.f32 %v1703_v48, %v738_v18 }
 0x188   : > { %v1748_v20 = vsel %vm1706_vm0, %v760_v16, %v782_v17 }
 0x189   : > { %v775_v21 = vmax.f32 %v739_v19, 0.0 }
 0x18b   : > { %v1752_v22 = vsel %vm1706_vm0, %v739_v19, %v775_v21  ;;  %v762_v23 = vpop.f32.mrf.mxu3 }
 0x18c   : > { %v763_v24 = vadd.f32 %v1703_v48, %v762_v23 }
 0x18e   : > { %v783_v25 = vmax.f32 %v763_v24, 0.0  ;;  %v741_v26 = vpop.f32.mrf.mxu2 }
 0x18f   : > { %v742_v27 = vadd.f32 %v1703_v48, %v741_v26 }
 0x190   : > { %v1758_v28 = vsel %vm1706_vm0, %v763_v24, %v783_v25 }
 0x191   : > { %v776_v29 = vmax.f32 %v742_v27, 0.0 }
 0x193   : > { %v1762_v30 = vsel %vm1706_vm0, %v742_v27, %v776_v29  ;;  %v765_v31 = vpop.f32.mrf.mxu3 }
 0x194   : > { %v766_v32 = vadd.f32 %v1703_v48, %v765_v31 }
 0x196   : > { %v784_v33 = vmax.f32 %v766_v32, 0.0  ;;  %v744_v34 = vpop.f32.mrf.mxu2 }
 0x197   : > { %v745_v35 = vadd.f32 %v1703_v48, %v744_v34 }
 0x198   : > { %v1768_v36 = vsel %vm1706_vm0, %v766_v32, %v784_v33 }
 0x199   : > { %v777_v37 = vmax.f32 %v745_v35, 0.0 }
 0x19b   : > { %v1772_v38 = vsel %vm1706_vm0, %v745_v35, %v777_v37 }
 0x19e   : > { %v747_v39 = vpop.f32.mrf.mxu2 }
 0x19f   : > { %v748_v40 = vadd.f32 %v1703_v48, %v747_v39 }
 0x1a1   : > { %v778_v41 = vmax.f32 %v748_v40, 0.0 }
 0x1a3   : > { %v1777_v42 = vsel %vm1706_vm0, %v748_v40, %v778_v41 }
 0x1a6   : > { %v750_v43 = vpop.f32.mrf.mxu2 }
 0x1a7   : > { %v751_v44 = vadd.f32 %v1703_v48, %v750_v43 }
 0x1a9   : > { %v779_v45 = vmax.f32 %v751_v44, 0.0 }
 0x1ab   : > { %v1782_v46 = vsel %vm1706_vm0, %v751_v44, %v779_v45 }
 0x1ae   : > { %v753_v47 = vpop.f32.mrf.mxu2 }
 0x1af   : > { %v754_v49 = vadd.f32 %v1703_v48, %v753_v47  ;;  %807 = sbr.rel (%p768_p0) target bundleno = 446 (0x1be), region = 44 }
 0x1b1   : > { %v780_v50 = vmax.f32 %v754_v49, 0.0 }
 0x1b3   : > { %v1787_v51 = vsel %vm1706_vm0, %v754_v49, %v780_v50 }
 0x1b4   : > { %v1269_v53 = vpack.c.bf16 %v1717_v58, %v1712_v54  ;;  %v1274_v55 = vpack.c.bf16 %v1727_v2, %v1722_v62  ;;  %v1279_v48 = vpack.c.bf16 %v1742_v14, %v1732_v6  ;;  %v1284_v52 = vpack.c.bf16 %v1762_v30, %v1752_v22 }
 0x1b5   : > { %v1289_v56 = vpack.c.bf16 %v1777_v42, %v1772_v38  ;;  %v1294_v57 = vpack.c.bf16 %v1787_v51, %v1782_v46  ;;  %v1299_v59 = vpack.c.bf16 %v1748_v20, %v1738_v12  ;;  %v1304_v60 = vpack.c.bf16 %v1768_v36, %v1758_v28 }
 0x1b6   : > { %1270 = vst [vmem:[%s827_s27] sm:$0xff] %v1269_v53  }
 0x1b7   : > { %1321 = vst [vmem:[%s827_s27 + $0x8] sm:$0xff] %v1274_v55  }
 0x1b8   : > { %1322 = vst [vmem:[%s827_s27 + $0x10] sm:$0xff] %v1279_v48  }
 0x1b9   : > { %1323 = vst [vmem:[%s827_s27 + $0x18] sm:$0xff] %v1284_v52  }
 0x1ba   : > { %1324 = vst [vmem:[%s827_s27 + $0x20] sm:$0xff] %v1289_v56  }
 0x1bb   : > { %1325 = vst [vmem:[%s827_s27 + $0x28] sm:$0xff] %v1294_v57  }
 0x1bc   : > { %1326 = vst [vmem:[%s827_s27 + $0x30] sm:$0xff] %v1299_v59  }
 0x1bd   : > { %1327 = vst [vmem:[%s827_s27 + $0x38] sm:$0xff] %v1304_v60  }
 0x1be PF: > { %s1814_s6 = scalar_lea.vmem %s1882_s1, %s1499_s23 }
 0x1bf   : > { %v845_v61 = vld [vmem:[%s1814_s6] sm:$0xff]  ;;  %s861_s7 = scalar_select %p768_p0, 1.0, 0.0  ;;  %v846_v63 = vld [vmem:[%s1814_s6 + $0x8] sm:$0xff]  ;;  %v847_v0 = vld [vmem:[%s1814_s6 + $0x10] sm:$0xff] }
 0x1c0   : > { %v848_v1 = vld [vmem:[%s1814_s6 + $0x18] sm:$0xff]  ;;  %v849_v3 = vld [vmem:[%s1814_s6 + $0x20] sm:$0xff]  ;;  %v850_v4 = vld [vmem:[%s1814_s6 + $0x28] sm:$0xff] }
 0x1c1   : > { %v862_v5 = vstv %s861_s7  ;;  %v851_v7 = vld [vmem:[%s1814_s6 + $0x30] sm:$0xff]  ;;  %v852_v13 = vld [vmem:[%s1814_s6 + $0x38] sm:$0xff]  ;;  %v853_v17 = vld [vmem:[%s1814_s6 + $0x40] sm:$0xff] }
 0x1c2   : > { %v863_v8 = vmul.f32 %v862_v5, %v845_v61  ;;  %v864_v9 = vmul.f32 %v862_v5, %v846_v63  ;;  %v865_v10 = vmul.f32 %v862_v5, %v847_v0  ;;  %v866_v11 = vmul.f32 %v862_v5, %v848_v1  ;;  %v854_v24 = vld [vmem:[%s1814_s6 + $0x48] sm:$0xff]  ;;  %v855_v27 = vld [vmem:[%s1814_s6 + $0x50] sm:$0xff]  ;;  %v857_v32 = vld [vmem:[%s1814_s6 + $0x60] sm:$0xff] }
 0x1c3   : > { %v867_v15 = vmul.f32 %v862_v5, %v849_v3  ;;  %v868_v16 = vmul.f32 %v862_v5, %v850_v4  ;;  %v869_v23 = vmul.f32 %v862_v5, %v851_v7  ;;  %v870_v26 = vmul.f32 %v862_v5, %v852_v13  ;;  %v858_v34 = vld [vmem:[%s1814_s6 + $0x68] sm:$0xff]  ;;  %v859_v37 = vld [vmem:[%s1814_s6 + $0x70] sm:$0xff]  ;;  %v860_v40 = vld [vmem:[%s1814_s6 + $0x78] sm:$0xff] }
 0x1c4   : > { %v879_v18 = vadd.f32 %v863_v8, %v1712_v54  ;;  %v880_v19 = vadd.f32 %v864_v9, %v1717_v58  ;;  %v881_v21 = vadd.f32 %v865_v10, %v1722_v62  ;;  %v882_v25 = vadd.f32 %v866_v11, %v1727_v2  ;;  %v856_v54 = vld [vmem:[%s1814_s6 + $0x58] sm:$0xff] }
 0x1c5   : > { %v883_v29 = vadd.f32 %v867_v15, %v1732_v6  ;;  %v871_v31 = vmul.f32 %v862_v5, %v853_v17  ;;  %v884_v58 = vadd.f32 %v868_v16, %v1742_v14  ;;  %v872_v62 = vmul.f32 %v862_v5, %v854_v24 }
 0x1c6   : > { %895 = vst [vmem:[%s1517_s9] sm:$0xff] %v879_v18  ;;  %v885_v2 = vadd.f32 %v869_v23, %v1752_v22  ;;  %v873_v33 = vmul.f32 %v862_v5, %v855_v27  ;;  %v886_v35 = vadd.f32 %v870_v26, %v1762_v30  ;;  %v874_v6 = vmul.f32 %v862_v5, %v856_v54 }
 0x1c7   : > { %896 = vst [vmem:[%s1517_s9 + $0x8] sm:$0xff] %v880_v19  ;;  %v887_v39 = vadd.f32 %v871_v31, %v1772_v38  ;;  %v875_v14 = vmul.f32 %v862_v5, %v857_v32  ;;  %v888_v22 = vadd.f32 %v872_v62, %v1777_v42  ;;  %v876_v41 = vmul.f32 %v862_v5, %v858_v34 }
 0x1c8   : > { %897 = vst [vmem:[%s1517_s9 + $0x10] sm:$0xff] %v881_v21  ;;  %v889_v30 = vadd.f32 %v873_v33, %v1782_v46  ;;  %v877_v43 = vmul.f32 %v862_v5, %v859_v37  ;;  %v890_v44 = vadd.f32 %v874_v6, %v1787_v51  ;;  %v878_v38 = vmul.f32 %v862_v5, %v860_v40 }
 0x1c9   : > { %898 = vst [vmem:[%s1517_s9 + $0x18] sm:$0xff] %v882_v25  ;;  %v891_v45 = vadd.f32 %v875_v14, %v1738_v12  ;;  %v892_v47 = vadd.f32 %v876_v41, %v1748_v20 }
 0x1ca   : > { %899 = vst [vmem:[%s1517_s9 + $0x20] sm:$0xff] %v883_v29  ;;  %v893_v42 = vadd.f32 %v877_v43, %v1758_v28  ;;  %v894_v49 = vadd.f32 %v878_v38, %v1768_v36 }
 0x1cb   : > { %900 = vst [vmem:[%s1517_s9 + $0x28] sm:$0xff] %v884_v58 }
 0x1cc   : > { %901 = vst [vmem:[%s1517_s9 + $0x30] sm:$0xff] %v885_v2 }
 0x1cd   : > { %902 = vst [vmem:[%s1517_s9 + $0x38] sm:$0xff] %v886_v35 }
 0x1ce   : > { %903 = vst [vmem:[%s1517_s9 + $0x40] sm:$0xff] %v887_v39 }
 0x1cf   : > { %904 = vst [vmem:[%s1517_s9 + $0x48] sm:$0xff] %v888_v22 }
 0x1d0   : > { %905 = vst [vmem:[%s1517_s9 + $0x50] sm:$0xff] %v889_v30 }
 0x1d1   : > { %906 = vst [vmem:[%s1517_s9 + $0x58] sm:$0xff] %v890_v44 }
 0x1d2   : > { %907 = vst [vmem:[%s1517_s9 + $0x60] sm:$0xff] %v891_v45 }
 0x1d3   : > { %908 = vst [vmem:[%s1517_s9 + $0x68] sm:$0xff] %v892_v47 }
 0x1d4   : > { %909 = vst [vmem:[%s1517_s9 + $0x70] sm:$0xff] %v893_v42 }
 0x1d5   : > { %910 = vst [vmem:[%s1517_s9 + $0x78] sm:$0xff] %v894_v49 }
 0x1d6 PF: > { %s14_s19 = sadd.s32 1, %s1439_s19   ;;  %s1888_s15 = smov %s1431_s17 }
 0x1d7   : > { %p11_p1 = scmp.ge.s32.totalorder %s14_s19, 8   ;;  %s1889_s16 = smov %s1435_s18 }
 0x1d8   : > { %s1890_s17 = smov %s1893_s20  ;;  %s1891_s18 = smov %s1897_s21 }
 0x1d9   :  { %13 = sbr.rel (!%p11_p1) target bundleno = 3 (0x3), region = 81 }

</bundles_post_ra>
